<compile_context>
chip_gen: v7x
topology: tpu7x:2x2x1
jax: 0.10.0
libtpu: 0.0.40
codegen_flags: <defaults>
</compile_context>

<pallas_src>
import jax
import jax.numpy as jnp
from jax import lax
from jax.experimental import pallas as pl
from jax.experimental.pallas import tpu as pltpu


# ----------------------------------------------------------------------------
# Fused kernel: BatchNorm (batch stats) + bulk input projection + LSTM recurrence
# ----------------------------------------------------------------------------
def _batch_rnn_kernel(x_ref, gamma_ref, beta_ref, wih_t_ref, whh_t_ref,
                      o_ref, gx_sc):
    # x_ref:    (T, N, C)
    # gamma/beta: (1, C)
    # wih_t:    (C, 4H)   (pre-transposed PyTorch weight_ih)
    # whh_t:    (H, 4H)   (pre-transposed PyTorch weight_hh)
    # o_ref:    (T, N, H)
    # gx_sc:    (T, N, 4H) f32 scratch holding the precomputed input gates
    T, N, C = x_ref.shape
    H = whh_t_ref.shape[0]

    # ---- BatchNorm1d over the flattened (T*N) axis, kept resident in VMEM ----
    x = x_ref[...].reshape(T * N, C).astype(jnp.float32)
    m = T * N
    mean = jnp.sum(x, axis=0, keepdims=True) / m               # (1, C)
    xc = x - mean
    var = jnp.sum(xc * xc, axis=0, keepdims=True) / m          # biased variance
    scale = gamma_ref[...] * lax.rsqrt(var + 1e-5)             # (1, C)
    xn = xc * scale + beta_ref[...]                            # (T*N, C), in VMEM only

    # ---- Hoisted input projection: one well-shaped MXU matmul for all steps ----
    gx_sc[...] = jnp.dot(
        xn, wih_t_ref[...], preferred_element_type=jnp.float32
    ).reshape(T, N, 4 * H)

    whh_t = whh_t_ref[...]                                     # (H, 4H), resident

    # ---- Sequential LSTM recurrence (gate order [i, f, g, o], PyTorch) ----
    def step(t, carry):
        h, c = carry
        gates = gx_sc[t] + jnp.dot(h, whh_t,
                                   preferred_element_type=jnp.float32)  # (N, 4H)
        # 4H == 128 for H=32, so the gate tensor is exactly one lane tile wide.
        i_g = jax.nn.sigmoid(gates[:, 0 * H:1 * H])
        f_g = jax.nn.sigmoid(gates[:, 1 * H:2 * H])
        g_g = jnp.tanh(gates[:, 2 * H:3 * H])
        o_g = jax.nn.sigmoid(gates[:, 3 * H:4 * H])
        c_new = f_g * c + i_g * g_g
        h_new = o_g * jnp.tanh(c_new)
        o_ref[t] = h_new.astype(o_ref.dtype)                   # store into resident block
        return (h_new, c_new)

    h0 = jnp.zeros((N, H), jnp.float32)
    c0 = jnp.zeros((N, H), jnp.float32)
    lax.fori_loop(0, T, step, (h0, c0), unroll=True)


# ----------------------------------------------------------------------------
# BatchRNN forward (wrapper)
# ----------------------------------------------------------------------------
def batch_rnn_forward(x_tnc, params):
    T, N, C = x_tnc.shape
    w_ih, w_hh = params["w_ih"], params["w_hh"]                # (4H, C), (4H, H)
    H = w_hh.shape[1]
    wih_t = jnp.transpose(w_ih)                                # (C, 4H)
    whh_t = jnp.transpose(w_hh)                                # (H, 4H)
    gamma = params["bn_gamma"].reshape(1, C)
    beta = params["bn_beta"].reshape(1, C)

    out = pl.pallas_call(
        _batch_rnn_kernel,
        out_shape=jax.ShapeDtypeStruct((T, N, H), x_tnc.dtype),
        grid_spec=pltpu.PrefetchScalarGridSpec(
            num_scalar_prefetch=0,
            grid=(1,),
            in_specs=[
                pl.BlockSpec((T, N, C), lambda i: (0, 0, 0)),
                pl.BlockSpec((1, C), lambda i: (0, 0)),
                pl.BlockSpec((1, C), lambda i: (0, 0)),
                pl.BlockSpec((C, 4 * H), lambda i: (0, 0)),
                pl.BlockSpec((H, 4 * H), lambda i: (0, 0)),
            ],
            out_specs=pl.BlockSpec((T, N, H), lambda i: (0, 0, 0)),
            scratch_shapes=[
                pltpu.VMEM((T, N, 4 * H), jnp.float32),        # precomputed input gates
            ],
        ),
        compiler_params=pltpu.CompilerParams(
            dimension_semantics=("arbitrary",),                # single sequential launch
        ),
    )(x_tnc, gamma, beta, wih_t, whh_t)

    # TODO(synk): nn.Dropout(p=0.1) in train mode is stochastic; applied here as
    # identity (eval-mode semantics).
    # TODO(synk): for production sizes (large T*N*C / large H), chunk T inside the
    # kernel with a two-pass BatchNorm and cast matmul inputs to bf16 (v6e/v7x).
    return out


# ----------------------------------------------------------------------------
# Pure-JAX reference (silent sanity check)
# ----------------------------------------------------------------------------
def _reference(x_tnc, params):
    g = params["bn_gamma"]
    b = params["bn_beta"]
    mean = jnp.mean(x_tnc, axis=(0, 1), keepdims=True)
    var = jnp.mean((x_tnc - mean) ** 2, axis=(0, 1), keepdims=True)
    xn = (x_tnc - mean) * jax.lax.rsqrt(var + 1e-5) * g + b

    w_ih, w_hh = params["w_ih"], params["w_hh"]
    H = w_hh.shape[1]
    N = x_tnc.shape[1]

    def step(carry, x_t):
        h, c = carry
        gates = x_t @ w_ih.T + h @ w_hh.T
        i_g = jax.nn.sigmoid(gates[:, 0 * H:1 * H])
        f_g = jax.nn.sigmoid(gates[:, 1 * H:2 * H])
        g_g = jnp.tanh(gates[:, 2 * H:3 * H])
        o_g = jax.nn.sigmoid(gates[:, 3 * H:4 * H])
        c_new = f_g * c + i_g * g_g
        h_new = o_g * jnp.tanh(c_new)
        return (h_new, c_new), h_new

    h0 = jnp.zeros((N, H), jnp.float32)
    c0 = jnp.zeros((N, H), jnp.float32)
    _, hs = jax.lax.scan(step, (h0, c0), xn)
    return hs


if __name__ == "__main__":
    # Small shapes consistent with the module: seq T=8, batch N=2,
    # input_size C=16, hidden_size H=32.
    T, N, C, H = 8, 2, 16, 32

    key = jax.random.PRNGKey(0)
    kx, kih, khh = jax.random.split(key, 3)

    x = jax.random.normal(kx, (T, N, C), dtype=jnp.float32)

    # Parameter init mirroring PyTorch defaults:
    #  - LSTM weights ~ U(-1/sqrt(H), 1/sqrt(H)), no bias
    #  - BatchNorm1d: gamma=1, beta=0
    bound = 1.0 / jnp.sqrt(jnp.float32(H))
    params = {
        "w_ih": jax.random.uniform(kih, (4 * H, C), jnp.float32, -bound, bound),
        "w_hh": jax.random.uniform(khh, (4 * H, H), jnp.float32, -bound, bound),
        "bn_gamma": jnp.ones((C,), jnp.float32),
        "bn_beta": jnp.zeros((C,), jnp.float32),
    }

    out = batch_rnn_forward(x, params)
    out = jax.block_until_ready(out)

    ref = jax.block_until_ready(_reference(x, params))
    assert out.shape == (T, N, H)
    assert jnp.allclose(out, ref, atol=1e-5, rtol=1e-5), "mismatch vs reference"

    print("KERNEL_OK")
</pallas_src>

<mosaic_0001>
module attributes {stable_mosaic.version = 11 : i64} {
  func.func @_batch_rnn_kernel(%arg0: i32, %arg1: memref<8x2x16xf32, #tpu.memory_space<vmem>>, %arg2: memref<1x16xf32, #tpu.memory_space<vmem>>, %arg3: memref<1x16xf32, #tpu.memory_space<vmem>>, %arg4: memref<16x128xf32, #tpu.memory_space<vmem>>, %arg5: memref<32x128xf32, #tpu.memory_space<vmem>>, %arg6: memref<8x2x32xf32, #tpu.memory_space<vmem>>, %arg7: memref<8x2x128xf32, #tpu.memory_space<vmem>>) attributes {dimension_semantics = [#tpu.dimension_semantics<arbitrary>], iteration_bounds = array<i64: 1>, scalar_prefetch = 0 : i64, scratch_operands = 1 : i64, tpu.core_type = #tpu.core_type<tc>, window_params = [{pipeline_mode = #tpu.pipeline_mode<synchronous>, transform_indices = @transform_0, window_bounds = array<i64: 8, 2, 16>}, {pipeline_mode = #tpu.pipeline_mode<synchronous>, transform_indices = @transform_1, window_bounds = array<i64: 1, 16>}, {pipeline_mode = #tpu.pipeline_mode<synchronous>, transform_indices = @transform_2, window_bounds = array<i64: 1, 16>}, {pipeline_mode = #tpu.pipeline_mode<synchronous>, transform_indices = @transform_3, window_bounds = array<i64: 16, 128>}, {pipeline_mode = #tpu.pipeline_mode<synchronous>, transform_indices = @transform_4, window_bounds = array<i64: 32, 128>}, {pipeline_mode = #tpu.pipeline_mode<synchronous>, transform_indices = @transform_5, window_bounds = array<i64: 8, 2, 32>}]} {
    %c0 = arith.constant 0 : index
    %c0_0 = arith.constant 0 : index
    %c0_1 = arith.constant 0 : index
    %0 = vector.load %arg1[%c0, %c0_0, %c0_1] : memref<8x2x16xf32, #tpu.memory_space<vmem>>, vector<8x2x16xf32>
    %1 = vector.shape_cast %0 : vector<8x2x16xf32> to vector<16x16xf32>
    %cst = arith.constant dense<0.000000e+00> : vector<16xf32>
    %2 = vector.multi_reduction <add>, %1, %cst [0] : vector<16x16xf32> to vector<16xf32>
    %3 = vector.shape_cast %2 : vector<16xf32> to vector<1x16xf32>
    %cst_2 = arith.constant 1.600000e+01 : f32
    %4 = vector.broadcast %cst_2 : f32 to vector<1x16xf32>
    %5 = arith.divf %3, %4 : vector<1x16xf32>
    %6 = vector.broadcast %5 : vector<1x16xf32> to vector<16x16xf32>
    %7 = arith.subf %1, %6 : vector<16x16xf32>
    %8 = arith.mulf %7, %7 : vector<16x16xf32>
    %cst_3 = arith.constant dense<0.000000e+00> : vector<16xf32>
    %9 = vector.multi_reduction <add>, %8, %cst_3 [0] : vector<16x16xf32> to vector<16xf32>
    %10 = vector.shape_cast %9 : vector<16xf32> to vector<1x16xf32>
    %cst_4 = arith.constant 1.600000e+01 : f32
    %11 = vector.broadcast %cst_4 : f32 to vector<1x16xf32>
    %12 = arith.divf %10, %11 : vector<1x16xf32>
    %c0_5 = arith.constant 0 : index
    %c0_6 = arith.constant 0 : index
    %13 = vector.load %arg2[%c0_5, %c0_6] : memref<1x16xf32, #tpu.memory_space<vmem>>, vector<1x16xf32>
    %cst_7 = arith.constant 9.99999974E-6 : f32
    %14 = vector.broadcast %cst_7 : f32 to vector<1x16xf32>
    %15 = arith.addf %12, %14 : vector<1x16xf32>
    %16 = math.rsqrt %15 : vector<1x16xf32>
    %17 = arith.mulf %13, %16 : vector<1x16xf32>
    %18 = vector.broadcast %17 : vector<1x16xf32> to vector<16x16xf32>
    %19 = arith.mulf %7, %18 : vector<16x16xf32>
    %c0_8 = arith.constant 0 : index
    %c0_9 = arith.constant 0 : index
    %20 = vector.load %arg3[%c0_8, %c0_9] : memref<1x16xf32, #tpu.memory_space<vmem>>, vector<1x16xf32>
    %21 = vector.broadcast %20 : vector<1x16xf32> to vector<16x16xf32>
    %22 = arith.addf %19, %21 : vector<16x16xf32>
    %c0_10 = arith.constant 0 : index
    %c0_11 = arith.constant 0 : index
    %23 = vector.load %arg4[%c0_10, %c0_11] : memref<16x128xf32, #tpu.memory_space<vmem>>, vector<16x128xf32>
    %cst_12 = arith.constant dense<0.000000e+00> : vector<16x128xf32>
    %24 = tpu.matmul %22, %23, %cst_12 {dimension_numbers = #tpu.dot_dimension_numbers<[1], [0], [0], [1], [0, 0, 1, 1], [], []>} : vector<16x16xf32>, vector<16x128xf32>, vector<16x128xf32> -> vector<16x128xf32>
    %25 = vector.shape_cast %24 : vector<16x128xf32> to vector<8x2x128xf32>
    %c0_13 = arith.constant 0 : index
    %c0_14 = arith.constant 0 : index
    %c0_15 = arith.constant 0 : index
    %26 = vector.load %arg7[%c0_13, %c0_14, %c0_15] : memref<8x2x128xf32, #tpu.memory_space<vmem>>, vector<8x2x128xf32>
    tpu.vector_store %arg7[%c0_13, %c0_14, %c0_15], %25 {strides = array<i32>} : memref<8x2x128xf32, #tpu.memory_space<vmem>>, vector<8x2x128xf32>,
    %c0_16 = arith.constant 0 : index
    %c0_17 = arith.constant 0 : index
    %27 = vector.load %arg5[%c0_16, %c0_17] : memref<32x128xf32, #tpu.memory_space<vmem>>, vector<32x128xf32>
    %cst_18 = arith.constant 0.000000e+00 : f32
    %28 = vector.broadcast %cst_18 : f32 to vector<2x32xf32>
    %cst_19 = arith.constant 0.000000e+00 : f32
    %29 = vector.broadcast %cst_19 : f32 to vector<2x32xf32>
    %c0_i32 = arith.constant 0 : i32
    %30 = arith.index_cast %c0_i32 : i32 to index
    %c0_20 = arith.constant 0 : index
    %c0_21 = arith.constant 0 : index
    %31 = vector.load %arg7[%30, %c0_20, %c0_21] : memref<8x2x128xf32, #tpu.memory_space<vmem>>, vector<1x2x128xf32>
    %32 = vector.shape_cast %31 : vector<1x2x128xf32> to vector<2x128xf32>
    %cst_22 = arith.constant dense<0.000000e+00> : vector<2x128xf32>
    %33 = tpu.matmul %28, %27, %cst_22 {dimension_numbers = #tpu.dot_dimension_numbers<[1], [0], [0], [1], [0, 0, 1, 1], [], []>} : vector<2x32xf32>, vector<32x128xf32>, vector<2x128xf32> -> vector<2x128xf32>
    %34 = arith.addf %32, %33 : vector<2x128xf32>
    %35 = vector.extract_strided_slice %34 {offsets = [0, 0], sizes = [2, 32], strides = [1, 1]} : vector<2x128xf32> to vector<2x32xf32>
    %36 = arith.negf %35 : vector<2x32xf32>
    %37 = math.exp %36 : vector<2x32xf32>
    %cst_23 = arith.constant 1.000000e+00 : f32
    %38 = vector.broadcast %cst_23 : f32 to vector<2x32xf32>
    %39 = arith.addf %38, %37 : vector<2x32xf32>
    %40 = arith.divf %38, %39 : vector<2x32xf32>
    %41 = vector.extract_strided_slice %34 {offsets = [0, 32], sizes = [2, 32], strides = [1, 1]} : vector<2x128xf32> to vector<2x32xf32>
    %42 = arith.negf %41 : vector<2x32xf32>
    %43 = math.exp %42 : vector<2x32xf32>
    %cst_24 = arith.constant 1.000000e+00 : f32
    %44 = vector.broadcast %cst_24 : f32 to vector<2x32xf32>
    %45 = arith.addf %44, %43 : vector<2x32xf32>
    %46 = arith.divf %44, %45 : vector<2x32xf32>
    %47 = vector.extract_strided_slice %34 {offsets = [0, 64], sizes = [2, 32], strides = [1, 1]} : vector<2x128xf32> to vector<2x32xf32>
    %48 = math.tanh %47 : vector<2x32xf32>
    %49 = vector.extract_strided_slice %34 {offsets = [0, 96], sizes = [2, 32], strides = [1, 1]} : vector<2x128xf32> to vector<2x32xf32>
    %50 = arith.negf %49 : vector<2x32xf32>
    %51 = math.exp %50 : vector<2x32xf32>
    %cst_25 = arith.constant 1.000000e+00 : f32
    %52 = vector.broadcast %cst_25 : f32 to vector<2x32xf32>
    %53 = arith.addf %52, %51 : vector<2x32xf32>
    %54 = arith.divf %52, %53 : vector<2x32xf32>
    %55 = arith.mulf %46, %29 : vector<2x32xf32>
    %56 = arith.mulf %40, %48 : vector<2x32xf32>
    %57 = arith.addf %55, %56 : vector<2x32xf32>
    %58 = math.tanh %57 : vector<2x32xf32>
    %59 = arith.mulf %54, %58 : vector<2x32xf32>
    %60 = arith.index_cast %c0_i32 : i32 to index
    %c0_26 = arith.constant 0 : index
    %c0_27 = arith.constant 0 : index
    %61 = vector.load %arg6[%60, %c0_26, %c0_27] : memref<8x2x32xf32, #tpu.memory_space<vmem>>, vector<1x2x32xf32>
    %62 = vector.shape_cast %61 : vector<1x2x32xf32> to vector<2x32xf32>
    %63 = vector.shape_cast %59 : vector<2x32xf32> to vector<1x2x32xf32>
    tpu.vector_store %arg6[%60, %c0_26, %c0_27], %63 {strides = array<i32>} : memref<8x2x32xf32, #tpu.memory_space<vmem>>, vector<1x2x32xf32>,
    %c1_i32 = arith.constant 1 : i32
    %64 = arith.index_cast %c1_i32 : i32 to index
    %c0_28 = arith.constant 0 : index
    %c0_29 = arith.constant 0 : index
    %65 = vector.load %arg7[%64, %c0_28, %c0_29] : memref<8x2x128xf32, #tpu.memory_space<vmem>>, vector<1x2x128xf32>
    %66 = vector.shape_cast %65 : vector<1x2x128xf32> to vector<2x128xf32>
    %cst_30 = arith.constant dense<0.000000e+00> : vector<2x128xf32>
    %67 = tpu.matmul %59, %27, %cst_30 {dimension_numbers = #tpu.dot_dimension_numbers<[1], [0], [0], [1], [0, 0, 1, 1], [], []>} : vector<2x32xf32>, vector<32x128xf32>, vector<2x128xf32> -> vector<2x128xf32>
    %68 = arith.addf %66, %67 : vector<2x128xf32>
    %69 = vector.extract_strided_slice %68 {offsets = [0, 0], sizes = [2, 32], strides = [1, 1]} : vector<2x128xf32> to vector<2x32xf32>
    %70 = arith.negf %69 : vector<2x32xf32>
    %71 = math.exp %70 : vector<2x32xf32>
    %cst_31 = arith.constant 1.000000e+00 : f32
    %72 = vector.broadcast %cst_31 : f32 to vector<2x32xf32>
    %73 = arith.addf %72, %71 : vector<2x32xf32>
    %74 = arith.divf %72, %73 : vector<2x32xf32>
    %75 = vector.extract_strided_slice %68 {offsets = [0, 32], sizes = [2, 32], strides = [1, 1]} : vector<2x128xf32> to vector<2x32xf32>
    %76 = arith.negf %75 : vector<2x32xf32>
    %77 = math.exp %76 : vector<2x32xf32>
    %cst_32 = arith.constant 1.000000e+00 : f32
    %78 = vector.broadcast %cst_32 : f32 to vector<2x32xf32>
    %79 = arith.addf %78, %77 : vector<2x32xf32>
    %80 = arith.divf %78, %79 : vector<2x32xf32>
    %81 = vector.extract_strided_slice %68 {offsets = [0, 64], sizes = [2, 32], strides = [1, 1]} : vector<2x128xf32> to vector<2x32xf32>
    %82 = math.tanh %81 : vector<2x32xf32>
    %83 = vector.extract_strided_slice %68 {offsets = [0, 96], sizes = [2, 32], strides = [1, 1]} : vector<2x128xf32> to vector<2x32xf32>
    %84 = arith.negf %83 : vector<2x32xf32>
    %85 = math.exp %84 : vector<2x32xf32>
    %cst_33 = arith.constant 1.000000e+00 : f32
    %86 = vector.broadcast %cst_33 : f32 to vector<2x32xf32>
    %87 = arith.addf %86, %85 : vector<2x32xf32>
    %88 = arith.divf %86, %87 : vector<2x32xf32>
    %89 = arith.mulf %80, %57 : vector<2x32xf32>
    %90 = arith.mulf %74, %82 : vector<2x32xf32>
    %91 = arith.addf %89, %90 : vector<2x32xf32>
    %92 = math.tanh %91 : vector<2x32xf32>
    %93 = arith.mulf %88, %92 : vector<2x32xf32>
    %94 = arith.index_cast %c1_i32 : i32 to index
    %c0_34 = arith.constant 0 : index
    %c0_35 = arith.constant 0 : index
    %95 = vector.load %arg6[%94, %c0_34, %c0_35] : memref<8x2x32xf32, #tpu.memory_space<vmem>>, vector<1x2x32xf32>
    %96 = vector.shape_cast %95 : vector<1x2x32xf32> to vector<2x32xf32>
    %97 = vector.shape_cast %93 : vector<2x32xf32> to vector<1x2x32xf32>
    tpu.vector_store %arg6[%94, %c0_34, %c0_35], %97 {strides = array<i32>} : memref<8x2x32xf32, #tpu.memory_space<vmem>>, vector<1x2x32xf32>,
    %c2_i32 = arith.constant 2 : i32
    %98 = arith.index_cast %c2_i32 : i32 to index
    %c0_36 = arith.constant 0 : index
    %c0_37 = arith.constant 0 : index
    %99 = vector.load %arg7[%98, %c0_36, %c0_37] : memref<8x2x128xf32, #tpu.memory_space<vmem>>, vector<1x2x128xf32>
    %100 = vector.shape_cast %99 : vector<1x2x128xf32> to vector<2x128xf32>
    %cst_38 = arith.constant dense<0.000000e+00> : vector<2x128xf32>
    %101 = tpu.matmul %93, %27, %cst_38 {dimension_numbers = #tpu.dot_dimension_numbers<[1], [0], [0], [1], [0, 0, 1, 1], [], []>} : vector<2x32xf32>, vector<32x128xf32>, vector<2x128xf32> -> vector<2x128xf32>
    %102 = arith.addf %100, %101 : vector<2x128xf32>
    %103 = vector.extract_strided_slice %102 {offsets = [0, 0], sizes = [2, 32], strides = [1, 1]} : vector<2x128xf32> to vector<2x32xf32>
    %104 = arith.negf %103 : vector<2x32xf32>
    %105 = math.exp %104 : vector<2x32xf32>
    %cst_39 = arith.constant 1.000000e+00 : f32
    %106 = vector.broadcast %cst_39 : f32 to vector<2x32xf32>
    %107 = arith.addf %106, %105 : vector<2x32xf32>
    %108 = arith.divf %106, %107 : vector<2x32xf32>
    %109 = vector.extract_strided_slice %102 {offsets = [0, 32], sizes = [2, 32], strides = [1, 1]} : vector<2x128xf32> to vector<2x32xf32>
    %110 = arith.negf %109 : vector<2x32xf32>
    %111 = math.exp %110 : vector<2x32xf32>
    %cst_40 = arith.constant 1.000000e+00 : f32
    %112 = vector.broadcast %cst_40 : f32 to vector<2x32xf32>
    %113 = arith.addf %112, %111 : vector<2x32xf32>
    %114 = arith.divf %112, %113 : vector<2x32xf32>
    %115 = vector.extract_strided_slice %102 {offsets = [0, 64], sizes = [2, 32], strides = [1, 1]} : vector<2x128xf32> to vector<2x32xf32>
    %116 = math.tanh %115 : vector<2x32xf32>
    %117 = vector.extract_strided_slice %102 {offsets = [0, 96], sizes = [2, 32], strides = [1, 1]} : vector<2x128xf32> to vector<2x32xf32>
    %118 = arith.negf %117 : vector<2x32xf32>
    %119 = math.exp %118 : vector<2x32xf32>
    %cst_41 = arith.constant 1.000000e+00 : f32
    %120 = vector.broadcast %cst_41 : f32 to vector<2x32xf32>
    %121 = arith.addf %120, %119 : vector<2x32xf32>
    %122 = arith.divf %120, %121 : vector<2x32xf32>
    %123 = arith.mulf %114, %91 : vector<2x32xf32>
    %124 = arith.mulf %108, %116 : vector<2x32xf32>
    %125 = arith.addf %123, %124 : vector<2x32xf32>
    %126 = math.tanh %125 : vector<2x32xf32>
    %127 = arith.mulf %122, %126 : vector<2x32xf32>
    %128 = arith.index_cast %c2_i32 : i32 to index
    %c0_42 = arith.constant 0 : index
    %c0_43 = arith.constant 0 : index
    %129 = vector.load %arg6[%128, %c0_42, %c0_43] : memref<8x2x32xf32, #tpu.memory_space<vmem>>, vector<1x2x32xf32>
    %130 = vector.shape_cast %129 : vector<1x2x32xf32> to vector<2x32xf32>
    %131 = vector.shape_cast %127 : vector<2x32xf32> to vector<1x2x32xf32>
    tpu.vector_store %arg6[%128, %c0_42, %c0_43], %131 {strides = array<i32>} : memref<8x2x32xf32, #tpu.memory_space<vmem>>, vector<1x2x32xf32>,
    %c3_i32 = arith.constant 3 : i32
    %132 = arith.index_cast %c3_i32 : i32 to index
    %c0_44 = arith.constant 0 : index
    %c0_45 = arith.constant 0 : index
    %133 = vector.load %arg7[%132, %c0_44, %c0_45] : memref<8x2x128xf32, #tpu.memory_space<vmem>>, vector<1x2x128xf32>
    %134 = vector.shape_cast %133 : vector<1x2x128xf32> to vector<2x128xf32>
    %cst_46 = arith.constant dense<0.000000e+00> : vector<2x128xf32>
    %135 = tpu.matmul %127, %27, %cst_46 {dimension_numbers = #tpu.dot_dimension_numbers<[1], [0], [0], [1], [0, 0, 1, 1], [], []>} : vector<2x32xf32>, vector<32x128xf32>, vector<2x128xf32> -> vector<2x128xf32>
    %136 = arith.addf %134, %135 : vector<2x128xf32>
    %137 = vector.extract_strided_slice %136 {offsets = [0, 0], sizes = [2, 32], strides = [1, 1]} : vector<2x128xf32> to vector<2x32xf32>
    %138 = arith.negf %137 : vector<2x32xf32>
    %139 = math.exp %138 : vector<2x32xf32>
    %cst_47 = arith.constant 1.000000e+00 : f32
    %140 = vector.broadcast %cst_47 : f32 to vector<2x32xf32>
    %141 = arith.addf %140, %139 : vector<2x32xf32>
    %142 = arith.divf %140, %141 : vector<2x32xf32>
    %143 = vector.extract_strided_slice %136 {offsets = [0, 32], sizes = [2, 32], strides = [1, 1]} : vector<2x128xf32> to vector<2x32xf32>
    %144 = arith.negf %143 : vector<2x32xf32>
    %145 = math.exp %144 : vector<2x32xf32>
    %cst_48 = arith.constant 1.000000e+00 : f32
    %146 = vector.broadcast %cst_48 : f32 to vector<2x32xf32>
    %147 = arith.addf %146, %145 : vector<2x32xf32>
    %148 = arith.divf %146, %147 : vector<2x32xf32>
    %149 = vector.extract_strided_slice %136 {offsets = [0, 64], sizes = [2, 32], strides = [1, 1]} : vector<2x128xf32> to vector<2x32xf32>
    %150 = math.tanh %149 : vector<2x32xf32>
    %151 = vector.extract_strided_slice %136 {offsets = [0, 96], sizes = [2, 32], strides = [1, 1]} : vector<2x128xf32> to vector<2x32xf32>
    %152 = arith.negf %151 : vector<2x32xf32>
    %153 = math.exp %152 : vector<2x32xf32>
    %cst_49 = arith.constant 1.000000e+00 : f32
    %154 = vector.broadcast %cst_49 : f32 to vector<2x32xf32>
    %155 = arith.addf %154, %153 : vector<2x32xf32>
    %156 = arith.divf %154, %155 : vector<2x32xf32>
    %157 = arith.mulf %148, %125 : vector<2x32xf32>
    %158 = arith.mulf %142, %150 : vector<2x32xf32>
    %159 = arith.addf %157, %158 : vector<2x32xf32>
    %160 = math.tanh %159 : vector<2x32xf32>
    %161 = arith.mulf %156, %160 : vector<2x32xf32>
    %162 = arith.index_cast %c3_i32 : i32 to index
    %c0_50 = arith.constant 0 : index
    %c0_51 = arith.constant 0 : index
    %163 = vector.load %arg6[%162, %c0_50, %c0_51] : memref<8x2x32xf32, #tpu.memory_space<vmem>>, vector<1x2x32xf32>
    %164 = vector.shape_cast %163 : vector<1x2x32xf32> to vector<2x32xf32>
    %165 = vector.shape_cast %161 : vector<2x32xf32> to vector<1x2x32xf32>
    tpu.vector_store %arg6[%162, %c0_50, %c0_51], %165 {strides = array<i32>} : memref<8x2x32xf32, #tpu.memory_space<vmem>>, vector<1x2x32xf32>,
    %c4_i32 = arith.constant 4 : i32
    %166 = arith.index_cast %c4_i32 : i32 to index
    %c0_52 = arith.constant 0 : index
    %c0_53 = arith.constant 0 : index
    %167 = vector.load %arg7[%166, %c0_52, %c0_53] : memref<8x2x128xf32, #tpu.memory_space<vmem>>, vector<1x2x128xf32>
    %168 = vector.shape_cast %167 : vector<1x2x128xf32> to vector<2x128xf32>
    %cst_54 = arith.constant dense<0.000000e+00> : vector<2x128xf32>
    %169 = tpu.matmul %161, %27, %cst_54 {dimension_numbers = #tpu.dot_dimension_numbers<[1], [0], [0], [1], [0, 0, 1, 1], [], []>} : vector<2x32xf32>, vector<32x128xf32>, vector<2x128xf32> -> vector<2x128xf32>
    %170 = arith.addf %168, %169 : vector<2x128xf32>
    %171 = vector.extract_strided_slice %170 {offsets = [0, 0], sizes = [2, 32], strides = [1, 1]} : vector<2x128xf32> to vector<2x32xf32>
    %172 = arith.negf %171 : vector<2x32xf32>
    %173 = math.exp %172 : vector<2x32xf32>
    %cst_55 = arith.constant 1.000000e+00 : f32
    %174 = vector.broadcast %cst_55 : f32 to vector<2x32xf32>
    %175 = arith.addf %174, %173 : vector<2x32xf32>
    %176 = arith.divf %174, %175 : vector<2x32xf32>
    %177 = vector.extract_strided_slice %170 {offsets = [0, 32], sizes = [2, 32], strides = [1, 1]} : vector<2x128xf32> to vector<2x32xf32>
    %178 = arith.negf %177 : vector<2x32xf32>
    %179 = math.exp %178 : vector<2x32xf32>
    %cst_56 = arith.constant 1.000000e+00 : f32
    %180 = vector.broadcast %cst_56 : f32 to vector<2x32xf32>
    %181 = arith.addf %180, %179 : vector<2x32xf32>
    %182 = arith.divf %180, %181 : vector<2x32xf32>
    %183 = vector.extract_strided_slice %170 {offsets = [0, 64], sizes = [2, 32], strides = [1, 1]} : vector<2x128xf32> to vector<2x32xf32>
    %184 = math.tanh %183 : vector<2x32xf32>
    %185 = vector.extract_strided_slice %170 {offsets = [0, 96], sizes = [2, 32], strides = [1, 1]} : vector<2x128xf32> to vector<2x32xf32>
    %186 = arith.negf %185 : vector<2x32xf32>
    %187 = math.exp %186 : vector<2x32xf32>
    %cst_57 = arith.constant 1.000000e+00 : f32
    %188 = vector.broadcast %cst_57 : f32 to vector<2x32xf32>
    %189 = arith.addf %188, %187 : vector<2x32xf32>
    %190 = arith.divf %188, %189 : vector<2x32xf32>
    %191 = arith.mulf %182, %159 : vector<2x32xf32>
    %192 = arith.mulf %176, %184 : vector<2x32xf32>
    %193 = arith.addf %191, %192 : vector<2x32xf32>
    %194 = math.tanh %193 : vector<2x32xf32>
    %195 = arith.mulf %190, %194 : vector<2x32xf32>
    %196 = arith.index_cast %c4_i32 : i32 to index
    %c0_58 = arith.constant 0 : index
    %c0_59 = arith.constant 0 : index
    %197 = vector.load %arg6[%196, %c0_58, %c0_59] : memref<8x2x32xf32, #tpu.memory_space<vmem>>, vector<1x2x32xf32>
    %198 = vector.shape_cast %197 : vector<1x2x32xf32> to vector<2x32xf32>
    %199 = vector.shape_cast %195 : vector<2x32xf32> to vector<1x2x32xf32>
    tpu.vector_store %arg6[%196, %c0_58, %c0_59], %199 {strides = array<i32>} : memref<8x2x32xf32, #tpu.memory_space<vmem>>, vector<1x2x32xf32>,
    %c5_i32 = arith.constant 5 : i32
    %200 = arith.index_cast %c5_i32 : i32 to index
    %c0_60 = arith.constant 0 : index
    %c0_61 = arith.constant 0 : index
    %201 = vector.load %arg7[%200, %c0_60, %c0_61] : memref<8x2x128xf32, #tpu.memory_space<vmem>>, vector<1x2x128xf32>
    %202 = vector.shape_cast %201 : vector<1x2x128xf32> to vector<2x128xf32>
    %cst_62 = arith.constant dense<0.000000e+00> : vector<2x128xf32>
    %203 = tpu.matmul %195, %27, %cst_62 {dimension_numbers = #tpu.dot_dimension_numbers<[1], [0], [0], [1], [0, 0, 1, 1], [], []>} : vector<2x32xf32>, vector<32x128xf32>, vector<2x128xf32> -> vector<2x128xf32>
    %204 = arith.addf %202, %203 : vector<2x128xf32>
    %205 = vector.extract_strided_slice %204 {offsets = [0, 0], sizes = [2, 32], strides = [1, 1]} : vector<2x128xf32> to vector<2x32xf32>
    %206 = arith.negf %205 : vector<2x32xf32>
    %207 = math.exp %206 : vector<2x32xf32>
    %cst_63 = arith.constant 1.000000e+00 : f32
    %208 = vector.broadcast %cst_63 : f32 to vector<2x32xf32>
    %209 = arith.addf %208, %207 : vector<2x32xf32>
    %210 = arith.divf %208, %209 : vector<2x32xf32>
    %211 = vector.extract_strided_slice %204 {offsets = [0, 32], sizes = [2, 32], strides = [1, 1]} : vector<2x128xf32> to vector<2x32xf32>
    %212 = arith.negf %211 : vector<2x32xf32>
    %213 = math.exp %212 : vector<2x32xf32>
    %cst_64 = arith.constant 1.000000e+00 : f32
    %214 = vector.broadcast %cst_64 : f32 to vector<2x32xf32>
    %215 = arith.addf %214, %213 : vector<2x32xf32>
    %216 = arith.divf %214, %215 : vector<2x32xf32>
    %217 = vector.extract_strided_slice %204 {offsets = [0, 64], sizes = [2, 32], strides = [1, 1]} : vector<2x128xf32> to vector<2x32xf32>
    %218 = math.tanh %217 : vector<2x32xf32>
    %219 = vector.extract_strided_slice %204 {offsets = [0, 96], sizes = [2, 32], strides = [1, 1]} : vector<2x128xf32> to vector<2x32xf32>
    %220 = arith.negf %219 : vector<2x32xf32>
    %221 = math.exp %220 : vector<2x32xf32>
    %cst_65 = arith.constant 1.000000e+00 : f32
    %222 = vector.broadcast %cst_65 : f32 to vector<2x32xf32>
    %223 = arith.addf %222, %221 : vector<2x32xf32>
    %224 = arith.divf %222, %223 : vector<2x32xf32>
    %225 = arith.mulf %216, %193 : vector<2x32xf32>
    %226 = arith.mulf %210, %218 : vector<2x32xf32>
    %227 = arith.addf %225, %226 : vector<2x32xf32>
    %228 = math.tanh %227 : vector<2x32xf32>
    %229 = arith.mulf %224, %228 : vector<2x32xf32>
    %230 = arith.index_cast %c5_i32 : i32 to index
    %c0_66 = arith.constant 0 : index
    %c0_67 = arith.constant 0 : index
    %231 = vector.load %arg6[%230, %c0_66, %c0_67] : memref<8x2x32xf32, #tpu.memory_space<vmem>>, vector<1x2x32xf32>
    %232 = vector.shape_cast %231 : vector<1x2x32xf32> to vector<2x32xf32>
    %233 = vector.shape_cast %229 : vector<2x32xf32> to vector<1x2x32xf32>
    tpu.vector_store %arg6[%230, %c0_66, %c0_67], %233 {strides = array<i32>} : memref<8x2x32xf32, #tpu.memory_space<vmem>>, vector<1x2x32xf32>,
    %c6_i32 = arith.constant 6 : i32
    %234 = arith.index_cast %c6_i32 : i32 to index
    %c0_68 = arith.constant 0 : index
    %c0_69 = arith.constant 0 : index
    %235 = vector.load %arg7[%234, %c0_68, %c0_69] : memref<8x2x128xf32, #tpu.memory_space<vmem>>, vector<1x2x128xf32>
    %236 = vector.shape_cast %235 : vector<1x2x128xf32> to vector<2x128xf32>
    %cst_70 = arith.constant dense<0.000000e+00> : vector<2x128xf32>
    %237 = tpu.matmul %229, %27, %cst_70 {dimension_numbers = #tpu.dot_dimension_numbers<[1], [0], [0], [1], [0, 0, 1, 1], [], []>} : vector<2x32xf32>, vector<32x128xf32>, vector<2x128xf32> -> vector<2x128xf32>
    %238 = arith.addf %236, %237 : vector<2x128xf32>
    %239 = vector.extract_strided_slice %238 {offsets = [0, 0], sizes = [2, 32], strides = [1, 1]} : vector<2x128xf32> to vector<2x32xf32>
    %240 = arith.negf %239 : vector<2x32xf32>
    %241 = math.exp %240 : vector<2x32xf32>
    %cst_71 = arith.constant 1.000000e+00 : f32
    %242 = vector.broadcast %cst_71 : f32 to vector<2x32xf32>
    %243 = arith.addf %242, %241 : vector<2x32xf32>
    %244 = arith.divf %242, %243 : vector<2x32xf32>
    %245 = vector.extract_strided_slice %238 {offsets = [0, 32], sizes = [2, 32], strides = [1, 1]} : vector<2x128xf32> to vector<2x32xf32>
    %246 = arith.negf %245 : vector<2x32xf32>
    %247 = math.exp %246 : vector<2x32xf32>
    %cst_72 = arith.constant 1.000000e+00 : f32
    %248 = vector.broadcast %cst_72 : f32 to vector<2x32xf32>
    %249 = arith.addf %248, %247 : vector<2x32xf32>
    %250 = arith.divf %248, %249 : vector<2x32xf32>
    %251 = vector.extract_strided_slice %238 {offsets = [0, 64], sizes = [2, 32], strides = [1, 1]} : vector<2x128xf32> to vector<2x32xf32>
    %252 = math.tanh %251 : vector<2x32xf32>
    %253 = vector.extract_strided_slice %238 {offsets = [0, 96], sizes = [2, 32], strides = [1, 1]} : vector<2x128xf32> to vector<2x32xf32>
    %254 = arith.negf %253 : vector<2x32xf32>
    %255 = math.exp %254 : vector<2x32xf32>
    %cst_73 = arith.constant 1.000000e+00 : f32
    %256 = vector.broadcast %cst_73 : f32 to vector<2x32xf32>
    %257 = arith.addf %256, %255 : vector<2x32xf32>
    %258 = arith.divf %256, %257 : vector<2x32xf32>
    %259 = arith.mulf %250, %227 : vector<2x32xf32>
    %260 = arith.mulf %244, %252 : vector<2x32xf32>
    %261 = arith.addf %259, %260 : vector<2x32xf32>
    %262 = math.tanh %261 : vector<2x32xf32>
    %263 = arith.mulf %258, %262 : vector<2x32xf32>
    %264 = arith.index_cast %c6_i32 : i32 to index
    %c0_74 = arith.constant 0 : index
    %c0_75 = arith.constant 0 : index
    %265 = vector.load %arg6[%264, %c0_74, %c0_75] : memref<8x2x32xf32, #tpu.memory_space<vmem>>, vector<1x2x32xf32>
    %266 = vector.shape_cast %265 : vector<1x2x32xf32> to vector<2x32xf32>
    %267 = vector.shape_cast %263 : vector<2x32xf32> to vector<1x2x32xf32>
    tpu.vector_store %arg6[%264, %c0_74, %c0_75], %267 {strides = array<i32>} : memref<8x2x32xf32, #tpu.memory_space<vmem>>, vector<1x2x32xf32>,
    %c7_i32 = arith.constant 7 : i32
    %268 = arith.index_cast %c7_i32 : i32 to index
    %c0_76 = arith.constant 0 : index
    %c0_77 = arith.constant 0 : index
    %269 = vector.load %arg7[%268, %c0_76, %c0_77] : memref<8x2x128xf32, #tpu.memory_space<vmem>>, vector<1x2x128xf32>
    %270 = vector.shape_cast %269 : vector<1x2x128xf32> to vector<2x128xf32>
    %cst_78 = arith.constant dense<0.000000e+00> : vector<2x128xf32>
    %271 = tpu.matmul %263, %27, %cst_78 {dimension_numbers = #tpu.dot_dimension_numbers<[1], [0], [0], [1], [0, 0, 1, 1], [], []>} : vector<2x32xf32>, vector<32x128xf32>, vector<2x128xf32> -> vector<2x128xf32>
    %272 = arith.addf %270, %271 : vector<2x128xf32>
    %273 = vector.extract_strided_slice %272 {offsets = [0, 0], sizes = [2, 32], strides = [1, 1]} : vector<2x128xf32> to vector<2x32xf32>
    %274 = arith.negf %273 : vector<2x32xf32>
    %275 = math.exp %274 : vector<2x32xf32>
    %cst_79 = arith.constant 1.000000e+00 : f32
    %276 = vector.broadcast %cst_79 : f32 to vector<2x32xf32>
    %277 = arith.addf %276, %275 : vector<2x32xf32>
    %278 = arith.divf %276, %277 : vector<2x32xf32>
    %279 = vector.extract_strided_slice %272 {offsets = [0, 32], sizes = [2, 32], strides = [1, 1]} : vector<2x128xf32> to vector<2x32xf32>
    %280 = arith.negf %279 : vector<2x32xf32>
    %281 = math.exp %280 : vector<2x32xf32>
    %cst_80 = arith.constant 1.000000e+00 : f32
    %282 = vector.broadcast %cst_80 : f32 to vector<2x32xf32>
    %283 = arith.addf %282, %281 : vector<2x32xf32>
    %284 = arith.divf %282, %283 : vector<2x32xf32>
    %285 = vector.extract_strided_slice %272 {offsets = [0, 64], sizes = [2, 32], strides = [1, 1]} : vector<2x128xf32> to vector<2x32xf32>
    %286 = math.tanh %285 : vector<2x32xf32>
    %287 = vector.extract_strided_slice %272 {offsets = [0, 96], sizes = [2, 32], strides = [1, 1]} : vector<2x128xf32> to vector<2x32xf32>
    %288 = arith.negf %287 : vector<2x32xf32>
    %289 = math.exp %288 : vector<2x32xf32>
    %cst_81 = arith.constant 1.000000e+00 : f32
    %290 = vector.broadcast %cst_81 : f32 to vector<2x32xf32>
    %291 = arith.addf %290, %289 : vector<2x32xf32>
    %292 = arith.divf %290, %291 : vector<2x32xf32>
    %293 = arith.mulf %284, %261 : vector<2x32xf32>
    %294 = arith.mulf %278, %286 : vector<2x32xf32>
    %295 = arith.addf %293, %294 : vector<2x32xf32>
    %296 = math.tanh %295 : vector<2x32xf32>
    %297 = arith.mulf %292, %296 : vector<2x32xf32>
    %298 = arith.index_cast %c7_i32 : i32 to index
    %c0_82 = arith.constant 0 : index
    %c0_83 = arith.constant 0 : index
    %299 = vector.load %arg6[%298, %c0_82, %c0_83] : memref<8x2x32xf32, #tpu.memory_space<vmem>>, vector<1x2x32xf32>
    %300 = vector.shape_cast %299 : vector<1x2x32xf32> to vector<2x32xf32>
    %301 = vector.shape_cast %297 : vector<2x32xf32> to vector<1x2x32xf32>
    tpu.vector_store %arg6[%298, %c0_82, %c0_83], %301 {strides = array<i32>} : memref<8x2x32xf32, #tpu.memory_space<vmem>>, vector<1x2x32xf32>,
    %c8_i32 = arith.constant 8 : i32
    return
  }
  func.func @transform_0(%arg0: i32) -> (i32, i32, i32) {
    %c0_i32 = arith.constant 0 : i32
    %c0_i32_0 = arith.constant 0 : i32
    %c0_i32_1 = arith.constant 0 : i32
    %c0_i32_2 = arith.constant 0 : i32
    return %c0_i32, %c0_i32_0, %c0_i32_1 : i32, i32, i32
  }
  func.func @transform_1(%arg0: i32) -> (i32, i32) {
    %c0_i32 = arith.constant 0 : i32
    %c0_i32_0 = arith.constant 0 : i32
    %c0_i32_1 = arith.constant 0 : i32
    return %c0_i32, %c0_i32_0 : i32, i32
  }
  func.func @transform_2(%arg0: i32) -> (i32, i32) {
    %c0_i32 = arith.constant 0 : i32
    %c0_i32_0 = arith.constant 0 : i32
    %c0_i32_1 = arith.constant 0 : i32
    return %c0_i32, %c0_i32_0 : i32, i32
  }
  func.func @transform_3(%arg0: i32) -> (i32, i32) {
    %c0_i32 = arith.constant 0 : i32
    %c0_i32_0 = arith.constant 0 : i32
    %c0_i32_1 = arith.constant 0 : i32
    return %c0_i32, %c0_i32_0 : i32, i32
  }
  func.func @transform_4(%arg0: i32) -> (i32, i32) {
    %c0_i32 = arith.constant 0 : i32
    %c0_i32_0 = arith.constant 0 : i32
    %c0_i32_1 = arith.constant 0 : i32
    return %c0_i32, %c0_i32_0 : i32, i32
  }
  func.func @transform_5(%arg0: i32) -> (i32, i32, i32) {
    %c0_i32 = arith.constant 0 : i32
    %c0_i32_0 = arith.constant 0 : i32
    %c0_i32_1 = arith.constant 0 : i32
    %c0_i32_2 = arith.constant 0 : i32
    return %c0_i32, %c0_i32_0, %c0_i32_1 : i32, i32, i32
  }
}

</mosaic_0001>

<bundles_post_ra>
// kernel: tpu_custom_call.1
= control target key start
LH: loop header
LB: loop body
LE: loop exit
PB: predicated region body
PF: predicated region fallthrough
CT: control target
= control target key end

     0   :  { %10 = vsyncpa [#allocation4], 0  ;;  %s1958_s0 = inlined_call_operand.hbm [shape: f32[8,2,16], index: 0, kind: input, shape index: {}]   ;;  %s1959_s1 = inlined_call_operand.vmem [shape: f32[1,16], index: 1, kind: input, shape index: {}]   ;;  %s1960_s2 = inlined_call_operand.vmem [shape: f32[1,16], index: 2, kind: input, shape index: {}]   ;;  %s1961_s3 = inlined_call_operand.hbm [shape: f32[16,128], index: 3, kind: input, shape index: {}]   ;;  %s1962_s4 = inlined_call_operand.hbm [shape: f32[32,128], index: 4, kind: input, shape index: {}]   ;;  %s1963_s5 = inlined_call_operand.hbm [shape: f32[8,2,32], index: 5, kind: output, shape index: {}]  }
   0x1   :  { %11 = vsyncpa [#allocation7], 0 }
   0x2   :  { %12 = vsyncpa [#allocation5], 0  ;;  %s1715_s18 = smov [#allocation6]   ;;  %s1621_s22 = scalar_lea.hbm %s1961_s3, 256 }
   0x3   :  { %s34_s19 = sshll.u32 %s1715_s18, 4  ;;  %p1622_p0 = scmp.ne.s32.totalorder %s1961_s3, %s1621_s22  ;;  %s35_s19 = int_to_ptr.vmem [resolvable:$true] %s34_s19 }
   0x4   :  { %p1625_p1 = scmp.lt.u32.totalorder %s1621_s22, %s1961_s3 }
   0x6   :  { %p1627_p2 = pnand %p1625_p1, %p1622_p0 }
   0x8   :  { %1630 = shalt.err (!%p1627_p2)
}
   0x9   :  { %s1631_s27 = scalar_lea.vmem %s35_s19, 256  ;;  %p1636_p4 = scmp.lt.s32.totalorder %s35_s19, %s35_s19 }
   0xa   :  { %p1632_p3 = scmp.ne.s32.totalorder %s35_s19, %s1631_s27  ;;  %p1637_p5 = scmp.lt.s32.totalorder %s1631_s27, %s1631_s27 }
   0xc   :  { %p1638_p6 = por %p1637_p5, %p1636_p4 }
   0xe   :  { %p1639_p7 = pnand %p1638_p6, %p1632_p3 }
  0x10   :  { %1642 = shalt.err (!%p1639_p7)
}
  0x11   :  { %s1716_s28 = smov 128   ;;  %s1717_s29 = smov 8  }
  0x12   :  { %40 = dma.hbm_to_vmem [thread:$0]  %s1961_s3, 256, %s35_s19, [#allocation7], %s1716_s28, %s1716_s28, %s1717_s29  }
  0x13   :  { %s1718_s7 = smov [#allocation3]   ;;  %s1643_s11 = scalar_lea.hbm %s1958_s0, 256 }
  0x14   :  { %s18_s8 = sshll.u32 %s1718_s7, 4  ;;  %p1644_p8 = scmp.ne.s32.totalorder %s1958_s0, %s1643_s11  ;;  %s19_s8 = int_to_ptr.vmem [resolvable:$true] %s18_s8 }
  0x15   :  { %p1647_p9 = scmp.lt.u32.totalorder %s1643_s11, %s1958_s0 }
  0x17   :  { %p1649_p10 = pnand %p1647_p9, %p1644_p8 }
  0x19   :  { %1652 = shalt.err (!%p1649_p10)
}
  0x1a   :  { %s1653_s16 = scalar_lea.vmem %s19_s8, 256  ;;  %p1658_p12 = scmp.lt.s32.totalorder %s19_s8, %s19_s8 }
  0x1b   :  { %p1654_p11 = scmp.ne.s32.totalorder %s19_s8, %s1653_s16  ;;  %p1659_p13 = scmp.lt.s32.totalorder %s1653_s16, %s1653_s16 }
  0x1d   :  { %p1660_p0 = por %p1659_p13, %p1658_p12 }
  0x1f   :  { %p1661_p1 = pnand %p1660_p0, %p1654_p11 }
  0x21   :  { %1664 = shalt.err (!%p1661_p1)
}
  0x22   :  { %s1719_s3 = smov 32   ;;  %s1720_s17 = smov 2  }
  0x23   :  { %24 = dma.hbm_to_vmem [thread:$0]  %s1958_s0, 256, %s19_s8, [#allocation4], %s1719_s3, %s1719_s3, %s1720_s17  }
  0x24   :  { %s1721_s20 = smov [#allocation8]   ;;  %s1665_s24 = scalar_lea.hbm %s1962_s4, 512 }
  0x25   :  { %s46_s21 = sshll.u32 %s1721_s20, 4  ;;  %p1666_p2 = scmp.ne.s32.totalorder %s1962_s4, %s1665_s24  ;;  %s47_s21 = int_to_ptr.vmem [resolvable:$true] %s46_s21 }
  0x26   :  { %p1669_p3 = scmp.lt.u32.totalorder %s1665_s24, %s1962_s4 }
  0x28   :  { %p1671_p4 = pnand %p1669_p3, %p1666_p2 }
  0x2a   :  { %1674 = shalt.err (!%p1671_p4)
}
  0x2b   :  { %s1675_s6 = scalar_lea.vmem %s47_s21, 512  ;;  %p1680_p6 = scmp.lt.s32.totalorder %s47_s21, %s47_s21 }
  0x2c   :  { %p1676_p5 = scmp.ne.s32.totalorder %s47_s21, %s1675_s6  ;;  %p1681_p7 = scmp.lt.s32.totalorder %s1675_s6, %s1675_s6 }
  0x2e   :  { %p1682_p8 = por %p1681_p7, %p1680_p6 }
  0x30   :  { %p1683_p9 = pnand %p1682_p8, %p1676_p5 }
  0x32   :  { %1686 = shalt.err (!%p1683_p9)
}
  0x33   :  { %52 = dma.hbm_to_vmem [thread:$0]  %s1962_s4, 512, %s47_s21, [#allocation7], %s1716_s28, %s1716_s28, %s1717_s29  }
  0x34   :  { %1709 = dma.done.wait [#allocation4], 256  }
  0x35   :  { %1710 = vsyncadd [#allocation4], 4294967040 }
  0x36   :  { %1711 = dma.done.wait [#allocation7], 768  }
  0x37   :  { %1712 = vsyncadd [#allocation7], 4294966528  ;;  %v83_v0 = vlaneseq  ;;  %v1722_v1 = vmov 1983009808   ;;  %v1723_v3 = vmov 0.0|0.0   ;;  %vm1724_vm0 = vmmov 0  }
  0x38   :  { %v81_v2 = vunpack.c.l.s4 %v1722_v1  ;;  %1494 = vmatprep.subr.bf16.mxu1 %v1723_v3  ;;  %v1725_v4 = vmov 0.0   ;;  %v291_v7 = vld [vmem:[#allocation6] sm:$0xff]  ;;  %v292_v8 = vld [vmem:[#allocation6 + $0x8] sm:$0xff]  ;;  %v62_v9 = vld [vmem:[#allocation3] sm:$0x3]  ;;  %vm114_vm1 = vcmask 130048  }
  0x39   :  { %1410 = vmatprep.mubr.msk.f32.mxu1 %vm1724_vm0, %v1725_v4  ;;  %v1806_v6 = vshrl.u32 %v83_v0, 7  ;;  %v1490_v11 = vpack.c.bf16 %v292_v8, %v291_v7  ;;  %v63_v12 = vld [vmem:[#allocation3 + $0x2] sm:$0x3]  ;;  %v64_v13 = vld [vmem:[#allocation3 + $0x4] sm:$0x3]  ;;  %v467_v26 = vld [vmem:[#allocation8 + $0x8] sm:$0xff] }
  0x3a   :  { %v82_v5 = vunpack.c.0.s8 %v81_v2  ;;  %v65_v14 = vld [vmem:[#allocation3 + $0x6] sm:$0x3]  ;;  %v66_v15 = vld [vmem:[#allocation3 + $0x8] sm:$0x3]  ;;  %v67_v16 = vld [vmem:[#allocation3 + $0xa] sm:$0x3]  ;;  %v78_v18 = vcombine.low %v62_v9, %v63_v12 }
  0x3b   :  { %v68_v17 = vld [vmem:[#allocation3 + $0xc] sm:$0x3]  ;;  %v79_v19 = vcombine.low %v64_v13, %v65_v14  ;;  %1491 = vmatprep.subr.bf16.mxu0 %v1490_v11  ;;  %v69_v20 = vld [vmem:[#allocation3 + $0xe] sm:$0x3]  ;;  %v95_v21 = vcombine.low %v66_v15, %v67_v16  ;;  %v466_v25 = vld [vmem:[#allocation8] sm:$0xff]  ;;  %vm574_vm2 = vcmask 254976  }
  0x3c   :  { %v1809_v10 = vsub.s32 %v82_v5, %v1806_v6  ;;  %1493 = vmatpush3.bf16.msra.mxu0 %v1490_v11  ;;  %v96_v24 = vcombine.low %v68_v17, %v69_v20  ;;  %v468_v27 = vld [vmem:[#allocation8 + $0x10] sm:$0xff]  ;;  %v1814_v29 = vpack.c.bf16 %v467_v26, %v466_v25  ;;  %v469_v30 = vld [vmem:[#allocation8 + $0x18] sm:$0xff]  ;;  %vm471_vm3 = vcmask 261120  }
  0x3d   :  { %1500 = vmatprep.subr.bf16.mxu0 %v1723_v3  ;;  %v1819_v33 = vpack.c.bf16 %v469_v30, %v468_v27  ;;  %v1329_v27 = vld [vmem:[%s1960_s2] ss:$0 sm:$0xff]  ;;  %v225_v30 = vsub.s32 0, %v1806_v6  ;;  %s1727_s2 = smov [#allocation9]  }
  0x3e   :  { %v86_v22 = vrot.slane %v78_v18, %v1809_v10  ;;  %v93_v23 = vrot.slane %v79_v19, %v1809_v10  ;;  %v103_v28 = vrot.slane %v95_v21, %v1809_v10  ;;  %v110_v32 = vrot.slane %v96_v24, %v1809_v10  ;;  %1496 = vmatpush3.bf16.msra.mxu1 %v1814_v29  ;;  %s1316_s9 = sshll.u32 %s1727_s2, 4  ;;  %s1317_s9 = int_to_ptr.vmem [resolvable:$true] %s1316_s9 }
  0x3f   :  { %1497 = vmatprep.subr.bf16.mxu1 %v1723_v3  ;;  %s1687_s10 = scalar_lea.vmem %s1317_s9, 256  ;;  %p1692_p11 = scmp.lt.s32.totalorder %s1317_s9, %s1317_s9 }
  0x40   :  { %v94_v31 = vcombine.low %v86_v22, %v93_v23  ;;  %v111_v34 = vcombine.low %v103_v28, %v110_v32  ;;  %v218_v28 = vld [vmem:[%s1959_s1] sm:$0x1]  ;;  %v262_v32 = vcombine.high %v1329_v27, %v1329_v27  ;;  %s1726_s1 = smov 64   ;;  %p1688_p10 = scmp.ne.s32.totalorder %s1317_s9, %s1687_s10 }
  0x41   :  { %p1693_p12 = scmp.lt.s32.totalorder %s1687_s10, %s1687_s10 }
  0x42   :  { %v115_v35 = vsel %vm114_vm1, %v94_v31, 0.0  ;;  %v116_v36 = vsel %vm114_vm1, %v111_v34, 0.0  ;;  %1499 = vmatpush3.bf16.msra.mxu1 %v1819_v33 }
  0x43   :  { %v117_v37 = vadd.f32 %v116_v36, %v115_v35  ;;  %1506 = vmatprep.subr.bf16.mxu1 %v1723_v3  ;;  %v269_v35 = vrot.slane %v1329_v27, %v1809_v10  ;;  %p1694_p13 = por %p1693_p12, %p1692_p11 }
  0x45   :  { %v118_v38 = vrot.slane %v117_v37, 4  ;;  %1411 = vmatmul.mubr.f32.vlgmr.msra.gmra.mrb[0].mxu1 %v1725_v4  ;;  %p1695_p0 = pnand %p1694_p13, %p1688_p10 }
  0x46   :  { %1508 = vmatpush3.bf16.msra.mxu1 %v1814_v29  ;;  %1432 = vmatprep.mubr.msk.f32.mxu1 %vm1724_vm0, %v1725_v4 }
  0x47   :  { %v119_v39 = vadd.f32 %v118_v38, %v117_v37  ;;  %1509 = vmatprep.subr.bf16.mxu1 %v1723_v3  ;;  %v276_v37 = vrot.slane %v262_v32, %v1809_v10 }
  0x49   :  { %v120_v40 = vrot.slane %v119_v39, 2 }
  0x4a   :  { %1511 = vmatpush3.bf16.msra.mxu1 %v1819_v33 }
  0x4b   :  { %v121_v41 = vadd.f32 %v120_v40, %v119_v39  ;;  %1518 = vmatprep.subr.bf16.mxu1 %v1723_v3  ;;  %v277_v40 = vcombine.high %v269_v35, %v269_v35 }
  0x4d   :  { %v122_v42 = vrot.slane %v121_v41, 1 }
  0x4f   :  { %v123_v43 = vadd.f32 %v122_v42, %v121_v41 }
  0x51   :  { %v125_v44 = vmul.f32 0.0625, %v123_v43 }
  0x53   :  { %v127_v45 = vcombine.high %v125_v44, %v125_v44  ;;  %v134_v46 = vrot.slane %v125_v44, %v1809_v10 }
  0x55   :  { %v141_v47 = vrot.slane %v127_v45, %v1809_v10  ;;  %v142_v48 = vcombine.high %v134_v46, %v134_v46  ;;  %v148_v49 = vsub.f32 %v62_v9, %v134_v46  ;;  %v152_v50 = vsub.f32 %v66_v15, %v134_v46 }
  0x56   :  { %v278_v45 = vcombine.high %v276_v37, %v276_v37 }
  0x57   :  { %v143_v51 = vcombine.high %v141_v47, %v141_v47  ;;  %v149_v52 = vsub.f32 %v63_v12, %v142_v48  ;;  %v150_v53 = vsub.f32 %v64_v13, %v141_v47  ;;  %v153_v54 = vsub.f32 %v67_v16, %v142_v48 }
  0x58   :  { %v154_v55 = vsub.f32 %v68_v17, %v141_v47  ;;  %v156_v56 = vmul.f32 %v148_v49, %v148_v49  ;;  %v160_v57 = vmul.f32 %v152_v50, %v152_v50 }
  0x59   :  { %v151_v58 = vsub.f32 %v65_v14, %v143_v51  ;;  %v155_v59 = vsub.f32 %v69_v20, %v143_v51  ;;  %v157_v60 = vmul.f32 %v149_v52, %v149_v52  ;;  %v158_v61 = vmul.f32 %v150_v53, %v150_v53 }
  0x5a   :  { %v161_v62 = vmul.f32 %v153_v54, %v153_v54  ;;  %v162_v63 = vmul.f32 %v154_v55, %v154_v55 }
  0x5b   :  { %v159_v0 = vmul.f32 %v151_v58, %v151_v58  ;;  %v163_v1 = vmul.f32 %v155_v59, %v155_v59  ;;  %v172_v2 = vcombine.low %v156_v56, %v157_v60 }
  0x5c   :  { %v189_v5 = vcombine.low %v160_v57, %v161_v62 }
  0x5d   :  { %v173_v7 = vcombine.low %v158_v61, %v159_v0  ;;  %v180_v8 = vrot.slane %v172_v2, %v1809_v10  ;;  %v190_v9 = vcombine.low %v162_v63, %v163_v1 }
  0x5e   :  { %v197_v11 = vrot.slane %v189_v5, %v1809_v10 }
  0x5f   :  { %v187_v12 = vrot.slane %v173_v7, %v1809_v10  ;;  %v204_v13 = vrot.slane %v190_v9, %v1809_v10 }
  0x61   :  { %v188_v14 = vcombine.low %v180_v8, %v187_v12  ;;  %v205_v15 = vcombine.low %v197_v11, %v204_v13 }
  0x63   :  { %v208_v16 = vsel %vm114_vm1, %v188_v14, 0.0  ;;  %v209_v17 = vsel %vm114_vm1, %v205_v15, 0.0 }
  0x64   :  { %v210_v18 = vadd.f32 %v209_v17, %v208_v16 }
  0x66   :  { %v211_v19 = vrot.slane %v210_v18, 4 }
  0x68   :  { %v212_v20 = vadd.f32 %v211_v19, %v210_v18 }
  0x6a   :  { %v213_v21 = vrot.slane %v212_v20, 2 }
  0x6c   :  { %v214_v22 = vadd.f32 %v213_v21, %v212_v20 }
  0x6e   :  { %v215_v23 = vrot.slane %v214_v22, 1 }
  0x70   :  { %v216_v24 = vadd.f32 %v215_v23, %v214_v22 }
  0x72   :  { %v217_v25 = vmul.f32 0.0625, %v216_v24 }
  0x74   :  { %v219_v26 = vadd.f32 1e-05, %v217_v25 }
  0x76   :  { %1555 = vrsqrt.f32 %v219_v26 }
  0x80   :  { %v1556_v31 = vpop.eup %1555 }
  0x81   :  { %v221_v34 = vmul.f32 %v1556_v31, %v218_v28 }
  0x83   :  { %v226_v36 = vrot.slane %v221_v34, %v225_v30 }
  0x85   :  { %v227_v38 = vcombine.high %v226_v36, %v226_v36  ;;  %v234_v39 = vrot.slane %v226_v36, %v1809_v10 }
  0x87   :  { %v241_v41 = vrot.slane %v227_v38, %v1809_v10  ;;  %v242_v42 = vcombine.high %v234_v39, %v234_v39  ;;  %v248_v43 = vmul.f32 %v234_v39, %v148_v49  ;;  %v252_v44 = vmul.f32 %v234_v39, %v152_v50 }
  0x89   :  { %v243_v46 = vcombine.high %v241_v41, %v241_v41  ;;  %v249_v6 = vmul.f32 %v242_v42, %v149_v52  ;;  %v250_v47 = vmul.f32 %v241_v41, %v150_v53  ;;  %v253_v48 = vmul.f32 %v242_v42, %v153_v54 }
  0x8a   :  { %v283_v51 = vadd.f32 %v269_v35, %v248_v43  ;;  %v254_v56 = vmul.f32 %v241_v41, %v154_v55  ;;  %v287_v57 = vadd.f32 %v269_v35, %v252_v44 }
  0x8b   :  { %v251_v60 = vmul.f32 %v243_v46, %v151_v58  ;;  %v255_v61 = vmul.f32 %v243_v46, %v155_v59  ;;  %v284_v62 = vadd.f32 %v277_v40, %v249_v6  ;;  %v285_v63 = vadd.f32 %v276_v37, %v250_v47 }
  0x8c   :  { %v288_v0 = vadd.f32 %v277_v40, %v253_v48  ;;  %v289_v1 = vadd.f32 %v276_v37, %v254_v56 }
  0x8d   :  { %v286_v2 = vadd.f32 %v278_v45, %v251_v60  ;;  %v290_v5 = vadd.f32 %v278_v45, %v255_v61  ;;  %v301_v7 = vcombine.low %v283_v51, %v284_v62 }
  0x8e   :  { %v318_v8 = vcombine.low %v287_v57, %v288_v0 }
  0x8f   :  { %v302_v49 = vcombine.low %v285_v63, %v286_v2  ;;  %v309_v50 = vrot.slane %v301_v7, %v1809_v10  ;;  %v319_v9 = vcombine.low %v289_v1, %v290_v5 }
  0x90   :  { %v326_v52 = vrot.slane %v318_v8, %v1809_v10 }
  0x91   :  { %v316_v53 = vrot.slane %v302_v49, %v1809_v10  ;;  %v333_v54 = vrot.slane %v319_v9, %v1809_v10 }
  0x93   :  { %v317_v55 = vcombine.low %v309_v50, %v316_v53  ;;  %v334_v58 = vcombine.low %v326_v52, %v333_v54 }
  0x95   :  { %1399 = vmatprep.mubr.msk.f32.mxu0 %vm114_vm1, %v317_v55 }
  0x96   :  { %1400 = vmatmul.mubr.msk.f32.vlgmr.msra.gmra.mrb[0].mxu0 %vm114_vm1, %v334_v58 }
  0x97   :  { %1502 = vmatpush3.bf16.msra.mxu0 %v1814_v29  ;;  %1421 = vmatprep.mubr.msk.f32.mxu0 %vm1724_vm0, %v1725_v4 }
  0x98   :  { %1503 = vmatprep.subr.bf16.mxu0 %v1723_v3 }
  0x9b   :  { %1505 = vmatpush3.bf16.msra.mxu0 %v1819_v33 }
  0x9c   :  { %1512 = vmatprep.subr.bf16.mxu0 %v1723_v3 }
 0x118   :  { %v541_v59 = vpop.f32.mrb[0].mxu1 }
 0x119   :  { %v1412_v11 = vpop.f32.mrb[1].mxu1 }
 0x169   :  { %v1401_v12 = vpop.f32.mrb[0].mxu0 }
 0x16a   :  { %v433_v13 = vcombine.high %v1401_v12, %v1401_v12  ;;  %v440_v14 = vrot.slane %v1401_v12, %v1809_v10  ;;  %1334 = vst.sshfl [vmem:[#allocation2 + $0x8] sm:$0x3 pattern:$0x76325410] %v1401_v12  ;;  %v405_v15 = vpop.f32.mrb[1].mxu0 }
 0x16b   :  { %v416_v16 = vcombine.high %v405_v15, %v405_v15  ;;  %v423_v17 = vrot.slane %v405_v15, %v1809_v10  ;;  %1332 = vst.sshfl [vmem:[#allocation2] sm:$0x3 pattern:$0x76325410] %v405_v15 }
 0x16c   :  { %v447_v18 = vrot.slane %v433_v13, %v1809_v10  ;;  %v448_v19 = vcombine.high %v440_v14, %v440_v14  ;;  %1335 = vst.sshfl [vmem:[#allocation2 + $0xc] sm:$0x3 pattern:$0x76325410] %v433_v13 }
 0x16d   :  { %v430_v20 = vrot.slane %v416_v16, %v1809_v10  ;;  %v431_v21 = vcombine.high %v423_v17, %v423_v17  ;;  %1333 = vst.sshfl [vmem:[#allocation2 + $0x4] sm:$0x3 pattern:$0x76325410] %v416_v16 }
 0x16e   :  { %v449_v22 = vcombine.high %v447_v18, %v447_v18  ;;  %463 = vst [vmem:[#allocation2 + $0xa] sm:$0x3] %v448_v19 }
 0x16f   :  { %v432_v23 = vcombine.high %v430_v20, %v430_v20  ;;  %459 = vst [vmem:[#allocation2 + $0x2] sm:$0x3] %v431_v21 }
 0x170   :  { %465 = vst [vmem:[#allocation2 + $0xe] sm:$0x3] %v449_v22 }
 0x171   :  { %461 = vst [vmem:[#allocation2 + $0x6] sm:$0x3] %v432_v23 }
 0x172   :  { %v470_v24 = vld [vmem:[#allocation2] sm:$0x3] }
 0x173   :  { %v545_v25 = vadd.f32 %v541_v59, %v470_v24 }
 0x174   :  { %v682_v2 = vld [vmem:[#allocation2 + $0x4] sm:$0x3] }
 0x175   :  { %1557 = vtanh.f32 %v545_v25  ;;  %v1336_v27 = vmul.f32 -1.442695, %v545_v25 }
 0x176   :  { %v577_v41 = vld [vmem:[#allocation2 + $0x2] sm:$0x3] }
 0x177   :  { %1559 = vpow2.f32 %v1336_v27 }
 0x178   :  { %v787_v16 = vld [vmem:[#allocation2 + $0x6] sm:$0x3] }
 0x17f   :  { %v1558_v26 = vpop.eup %1557 }
 0x180   :  { %555 = vrot.lane.b32.xlu0 %v1558_v26, %s1726_s1 }
 0x181   :  { %v1560_v28 = vpop.eup %1559 }
 0x182   :  { %v549_v30 = vadd.f32 1.0, %v1560_v28 }
 0x184   :  { %1561 = vrcp.f32 %v549_v30 }
 0x18e   :  { %v1562_v10 = vpop.eup %1561 }
 0x18f   :  { %v553_v34 = vmul.f32 0.0, %v1562_v10 }
 0x1f2   :  { %v556_v31 = vpop.permute.xlu0 %555 }
 0x1f3   :  { %v558_v32 = vmul.f32 %v1562_v10, %v556_v31 }
 0x1f5   :  { %560 = vrot.lane.b32.xlu0 %v558_v32, %s1719_s3 }
 0x267   :  { %v561_v35 = vpop.permute.xlu0 %560 }
 0x268   :  { %v563_v36 = vadd.f32 %v561_v35, %v553_v34  ;;  %v892_v35 = vld [vmem:[#allocation2 + $0x8] sm:$0x3] }
 0x26a   :  { %1563 = vtanh.f32 %v563_v36 }
 0x274   :  { %v1564_v37 = vpop.eup %1563 }
 0x275   :  { %566 = vrot.lane.b32.xlu1 %v1564_v37, %s1726_s1 }
 0x2e7   :  { %v567_v38 = vpop.permute.xlu1 %566 }
 0x2e8   :  { %v569_v39 = vmul.f32 %v1562_v10, %v567_v38 }
 0x2ea   :  { %571 = vrot.lane.b32.xlu1 %v569_v39, %s1719_s3 }
 0x35c   :  { %v572_v40 = vpop.permute.xlu1 %571 }
 0x35d   :  { %575 = vst.msk [vmem:[#allocation9] sm:$0x3] %vm574_vm2, %v572_v40  ;;  %1422 = vmatmul.mubr.msk.f32.vlgmr.msra.gmra.mrb[2].mxu0 %vm471_vm3, %v572_v40 }
 0x35e   :  { %1514 = vmatpush3.bf16.msra.mxu0 %v1814_v29  ;;  %1443 = vmatprep.mubr.msk.f32.mxu0 %vm1724_vm0, %v1725_v4 }
 0x35f   :  { %1515 = vmatprep.subr.bf16.mxu0 %v1723_v3 }
 0x362   :  { %1517 = vmatpush3.bf16.msra.mxu0 %v1819_v33 }
 0x363   :  { %1524 = vmatprep.subr.bf16.mxu0 %v1723_v3 }
 0x430   :  { %v646_v42 = vpop.f32.mrb[2].mxu0 }
 0x431   :  { %v650_v43 = vadd.f32 %v646_v42, %v577_v41  ;;  %v1423_v44 = vpop.f32.mrb[3].mxu0 }
 0x433   :  { %1565 = vtanh.f32 %v650_v43  ;;  %v1338_v46 = vmul.f32 -1.442695, %v650_v43 }
 0x435   :  { %1567 = vpow2.f32 %v1338_v46 }
 0x43d   :  { %v1566_v45 = vpop.eup %1565 }
 0x43e   :  { %660 = vrot.lane.b32.xlu0 %v1566_v45, %s1726_s1 }
 0x43f   :  { %v1568_v6 = vpop.eup %1567 }
 0x440   :  { %v654_v47 = vadd.f32 1.0, %v1568_v6 }
 0x442   :  { %1569 = vrcp.f32 %v654_v47 }
 0x44c   :  { %v1570_v48 = vpop.eup %1569 }
 0x44d   :  { %v658_v57 = vmul.f32 %v1570_v48, %v563_v36 }
 0x4b0   :  { %v661_v51 = vpop.permute.xlu0 %660 }
 0x4b1   :  { %v663_v56 = vmul.f32 %v1570_v48, %v661_v51 }
 0x4b3   :  { %665 = vrot.lane.b32.xlu1 %v663_v56, %s1719_s3 }
 0x525   :  { %v666_v60 = vpop.permute.xlu1 %665 }
 0x526   :  { %v668_v61 = vadd.f32 %v666_v60, %v658_v57  ;;  %v997_v60 = vld [vmem:[#allocation2 + $0xa] sm:$0x3] }
 0x528   :  { %1571 = vtanh.f32 %v668_v61 }
 0x532   :  { %v1572_v62 = vpop.eup %1571 }
 0x533   :  { %671 = vrot.lane.b32.xlu0 %v1572_v62, %s1726_s1 }
 0x5a5   :  { %v672_v63 = vpop.permute.xlu0 %671 }
 0x5a6   :  { %v674_v0 = vmul.f32 %v1570_v48, %v672_v63 }
 0x5a8   :  { %676 = vrot.lane.b32.xlu1 %v674_v0, %s1719_s3 }
 0x61a   :  { %v677_v1 = vpop.permute.xlu1 %676 }
 0x61b   :  { %680 = vst.msk [vmem:[#allocation9 + $0x2] sm:$0x3] %vm574_vm2, %v677_v1  ;;  %1433 = vmatmul.mubr.msk.f32.vlgmr.msra.gmra.mrb[2].mxu1 %vm471_vm3, %v677_v1 }
 0x61c   :  { %1520 = vmatpush3.bf16.msra.mxu1 %v1814_v29  ;;  %1454 = vmatprep.mubr.msk.f32.mxu1 %vm1724_vm0, %v1725_v4 }
 0x61d   :  { %1521 = vmatprep.subr.bf16.mxu1 %v1723_v3 }
 0x620   :  { %1523 = vmatpush3.bf16.msra.mxu1 %v1819_v33 }
 0x621   :  { %1530 = vmatprep.subr.bf16.mxu1 %v1723_v3 }
 0x6ee   :  { %v751_v5 = vpop.f32.mrb[2].mxu1 }
 0x6ef   :  { %v755_v7 = vadd.f32 %v751_v5, %v682_v2  ;;  %v1434_v8 = vpop.f32.mrb[3].mxu1 }
 0x6f1   :  { %1573 = vtanh.f32 %v755_v7  ;;  %v1340_v50 = vmul.f32 -1.442695, %v755_v7 }
 0x6f3   :  { %1575 = vpow2.f32 %v1340_v50 }
 0x6fb   :  { %v1574_v49 = vpop.eup %1573 }
 0x6fc   :  { %765 = vrot.lane.b32.xlu0 %v1574_v49, %s1726_s1 }
 0x6fd   :  { %v1576_v9 = vpop.eup %1575 }
 0x6fe   :  { %v759_v52 = vadd.f32 1.0, %v1576_v9 }
 0x700   :  { %1577 = vrcp.f32 %v759_v52 }
 0x70a   :  { %v1578_v53 = vpop.eup %1577 }
 0x70b   :  { %v763_v58 = vmul.f32 %v1578_v53, %v668_v61 }
 0x76e   :  { %v766_v54 = vpop.permute.xlu0 %765 }
 0x76f   :  { %v768_v55 = vmul.f32 %v1578_v53, %v766_v54 }
 0x771   :  { %770 = vrot.lane.b32.xlu1 %v768_v55, %s1719_s3 }
 0x7e3   :  { %v771_v59 = vpop.permute.xlu1 %770 }
 0x7e4   :  { %v773_v11 = vadd.f32 %v771_v59, %v763_v58 }
 0x7e6   :  { %1579 = vtanh.f32 %v773_v11 }
 0x7f0   :  { %v1580_v12 = vpop.eup %1579 }
 0x7f1   :  { %776 = vrot.lane.b32.xlu0 %v1580_v12, %s1726_s1 }
 0x863   :  { %v777_v13 = vpop.permute.xlu0 %776 }
 0x864   :  { %v779_v14 = vmul.f32 %v1578_v53, %v777_v13  ;;  %v1102_v53 = vld [vmem:[#allocation2 + $0xc] sm:$0x3] }
 0x866   :  { %781 = vrot.lane.b32.xlu1 %v779_v14, %s1719_s3 }
 0x8d8   :  { %v782_v15 = vpop.permute.xlu1 %781 }
 0x8d9   :  { %785 = vst.msk [vmem:[#allocation9 + $0x4] sm:$0x3] %vm574_vm2, %v782_v15  ;;  %1444 = vmatmul.mubr.msk.f32.vlgmr.msra.gmra.mrb[4].mxu0 %vm471_vm3, %v782_v15 }
 0x8da   :  { %1526 = vmatpush3.bf16.msra.mxu0 %v1814_v29  ;;  %1465 = vmatprep.mubr.msk.f32.mxu0 %vm1724_vm0, %v1725_v4 }
 0x8db   :  { %1527 = vmatprep.subr.bf16.mxu0 %v1723_v3 }
 0x8de   :  { %1529 = vmatpush3.bf16.msra.mxu0 %v1819_v33 }
 0x8df   :  { %1536 = vmatprep.subr.bf16.mxu0 %v1723_v3 }
 0x9ac   :  { %v856_v17 = vpop.f32.mrb[4].mxu0 }
 0x9ad   :  { %v860_v18 = vadd.f32 %v856_v17, %v787_v16  ;;  %v1445_v19 = vpop.f32.mrb[5].mxu0 }
 0x9af   :  { %1581 = vtanh.f32 %v860_v18  ;;  %v1342_v21 = vmul.f32 -1.442695, %v860_v18 }
 0x9b1   :  { %1583 = vpow2.f32 %v1342_v21 }
 0x9b9   :  { %v1582_v20 = vpop.eup %1581 }
 0x9ba   :  { %870 = vrot.lane.b32.xlu0 %v1582_v20, %s1726_s1 }
 0x9bb   :  { %v1584_v22 = vpop.eup %1583 }
 0x9bc   :  { %v864_v23 = vadd.f32 1.0, %v1584_v22 }
 0x9be   :  { %1585 = vrcp.f32 %v864_v23 }
 0x9c8   :  { %v1586_v24 = vpop.eup %1585 }
 0x9c9   :  { %v868_v27 = vmul.f32 %v1586_v24, %v773_v11 }
 0xa2c   :  { %v871_v25 = vpop.permute.xlu0 %870 }
 0xa2d   :  { %v873_v26 = vmul.f32 %v1586_v24, %v871_v25 }
 0xa2f   :  { %875 = vrot.lane.b32.xlu1 %v873_v26, %s1719_s3 }
 0xaa1   :  { %v876_v28 = vpop.permute.xlu1 %875 }
 0xaa2   :  { %v878_v30 = vadd.f32 %v876_v28, %v868_v27 }
 0xaa4   :  { %1587 = vtanh.f32 %v878_v30 }
 0xaae   :  { %v1588_v10 = vpop.eup %1587 }
 0xaaf   :  { %881 = vrot.lane.b32.xlu0 %v1588_v10, %s1726_s1 }
 0xb21   :  { %v882_v31 = vpop.permute.xlu0 %881 }
 0xb22   :  { %v884_v32 = vmul.f32 %v1586_v24, %v882_v31  ;;  %v1207_v24 = vld [vmem:[#allocation2 + $0xe] sm:$0x3] }
 0xb24   :  { %886 = vrot.lane.b32.xlu1 %v884_v32, %s1719_s3 }
 0xb96   :  { %v887_v34 = vpop.permute.xlu1 %886 }
 0xb97   :  { %890 = vst.msk [vmem:[#allocation9 + $0x6] sm:$0x3] %vm574_vm2, %v887_v34  ;;  %1455 = vmatmul.mubr.msk.f32.vlgmr.msra.gmra.mrb[4].mxu1 %vm471_vm3, %v887_v34 }
 0xb98   :  { %1532 = vmatpush3.bf16.msra.mxu1 %v1814_v29  ;;  %1476 = vmatprep.mubr.msk.f32.mxu1 %vm1724_vm0, %v1725_v4 }
 0xb99   :  { %1533 = vmatprep.subr.bf16.mxu1 %v1723_v3 }
 0xb9c   :  { %1535 = vmatpush3.bf16.msra.mxu1 %v1819_v33 }
 0xc6a   :  { %v961_v36 = vpop.f32.mrb[4].mxu1 }
 0xc6b   :  { %v965_v37 = vadd.f32 %v961_v36, %v892_v35  ;;  %v1456_v38 = vpop.f32.mrb[5].mxu1 }
 0xc6d   :  { %1589 = vtanh.f32 %v965_v37  ;;  %v1344_v40 = vmul.f32 -1.442695, %v965_v37 }
 0xc6f   :  { %1591 = vpow2.f32 %v1344_v40 }
 0xc77   :  { %v1590_v39 = vpop.eup %1589 }
 0xc78   :  { %975 = vrot.lane.b32.xlu0 %v1590_v39, %s1726_s1 }
 0xc79   :  { %v1592_v41 = vpop.eup %1591 }
 0xc7a   :  { %v969_v42 = vadd.f32 1.0, %v1592_v41 }
 0xc7c   :  { %1593 = vrcp.f32 %v969_v42 }
 0xc86   :  { %v1594_v43 = vpop.eup %1593 }
 0xc87   :  { %v973_v46 = vmul.f32 %v1594_v43, %v878_v30 }
 0xcea   :  { %v976_v44 = vpop.permute.xlu0 %975 }
 0xceb   :  { %v978_v45 = vmul.f32 %v1594_v43, %v976_v44 }
 0xced   :  { %980 = vrot.lane.b32.xlu1 %v978_v45, %s1719_s3 }
 0xd5f   :  { %v981_v6 = vpop.permute.xlu1 %980 }
 0xd60   :  { %v983_v47 = vadd.f32 %v981_v6, %v973_v46 }
 0xd62   :  { %1595 = vtanh.f32 %v983_v47 }
 0xd6c   :  { %v1596_v48 = vpop.eup %1595 }
 0xd6d   :  { %986 = vrot.lane.b32.xlu0 %v1596_v48, %s1726_s1 }
 0xddf   :  { %v987_v51 = vpop.permute.xlu0 %986 }
 0xde0   :  { %v989_v56 = vmul.f32 %v1594_v43, %v987_v51 }
 0xde2   :  { %991 = vrot.lane.b32.xlu1 %v989_v56, %s1719_s3 }
 0xe54   :  { %v992_v57 = vpop.permute.xlu1 %991 }
 0xe55   :  { %995 = vst.msk [vmem:[#allocation9 + $0x8] sm:$0x3] %vm574_vm2, %v992_v57  ;;  %1466 = vmatmul.mubr.msk.f32.vlgmr.msra.gmra.mrb[6].mxu0 %vm471_vm3, %v992_v57 }
 0xe56   :  { %1538 = vmatpush3.bf16.msra.mxu0 %v1814_v29  ;;  %1487 = vmatprep.mubr.msk.f32.mxu0 %vm1724_vm0, %v1725_v4 }
 0xe57   :  { %1539 = vmatprep.subr.bf16.mxu0 %v1723_v3 }
 0xe5a   :  { %1541 = vmatpush3.bf16.msra.mxu0 %v1819_v33 }
 0xf28   :  { %v1066_v61 = vpop.f32.mrb[6].mxu0 }
 0xf29   :  { %v1070_v62 = vadd.f32 %v1066_v61, %v997_v60  ;;  %v1467_v63 = vpop.f32.mrb[7].mxu0 }
 0xf2b   :  { %1597 = vtanh.f32 %v1070_v62  ;;  %v1346_v1 = vmul.f32 -1.442695, %v1070_v62 }
 0xf2d   :  { %1599 = vpow2.f32 %v1346_v1 }
 0xf35   :  { %v1598_v0 = vpop.eup %1597 }
 0xf36   :  { %1080 = vrot.lane.b32.xlu0 %v1598_v0, %s1726_s1 }
 0xf37   :  { %v1600_v2 = vpop.eup %1599 }
 0xf38   :  { %v1074_v5 = vadd.f32 1.0, %v1600_v2 }
 0xf3a   :  { %1601 = vrcp.f32 %v1074_v5 }
 0xf44   :  { %v1602_v29 = vpop.eup %1601 }
 0xf45   :  { %v1078_v3 = vmul.f32 %v1602_v29, %v983_v47 }
 0xfa8   :  { %v1081_v7 = vpop.permute.xlu0 %1080 }
 0xfa9   :  { %v1083_v4 = vmul.f32 %v1602_v29, %v1081_v7 }
 0xfab   :  { %1085 = vrot.lane.b32.xlu1 %v1083_v4, %s1719_s3 }
0x101d   :  { %v1086_v33 = vpop.permute.xlu1 %1085 }
0x101e   :  { %v1088_v8 = vadd.f32 %v1086_v33, %v1078_v3 }
0x1020   :  { %1603 = vtanh.f32 %v1088_v8 }
0x102a   :  { %v1604_v49 = vpop.eup %1603 }
0x102b   :  { %1091 = vrot.lane.b32.xlu0 %v1604_v49, %s1726_s1 }
0x109d   :  { %v1092_v50 = vpop.permute.xlu0 %1091 }
0x109e   :  { %v1094_v9 = vmul.f32 %v1602_v29, %v1092_v50 }
0x10a0   :  { %1096 = vrot.lane.b32.xlu1 %v1094_v9, %s1719_s3 }
0x1112   :  { %v1097_v52 = vpop.permute.xlu1 %1096 }
0x1113   :  { %1100 = vst.msk [vmem:[#allocation9 + $0xa] sm:$0x3] %vm574_vm2, %v1097_v52  ;;  %1477 = vmatmul.mubr.msk.f32.vlgmr.msra.gmra.mrb[6].mxu1 %vm471_vm3, %v1097_v52 }
0x11e6   :  { %v1171_v54 = vpop.f32.mrb[6].mxu1 }
0x11e7   :  { %v1175_v55 = vadd.f32 %v1171_v54, %v1102_v53  ;;  %v1478_v58 = vpop.f32.mrb[7].mxu1 }
0x11e9   :  { %1605 = vtanh.f32 %v1175_v55  ;;  %v1348_v11 = vmul.f32 -1.442695, %v1175_v55 }
0x11eb   :  { %1607 = vpow2.f32 %v1348_v11 }
0x11f3   :  { %v1606_v59 = vpop.eup %1605 }
0x11f4   :  { %1185 = vrot.lane.b32.xlu0 %v1606_v59, %s1726_s1 }
0x11f5   :  { %v1608_v12 = vpop.eup %1607 }
0x11f6   :  { %v1179_v13 = vadd.f32 1.0, %v1608_v12 }
0x11f8   :  { %1609 = vrcp.f32 %v1179_v13 }
0x1202   :  { %v1610_v14 = vpop.eup %1609 }
0x1203   :  { %v1183_v17 = vmul.f32 %v1610_v14, %v1088_v8 }
0x1266   :  { %v1186_v15 = vpop.permute.xlu0 %1185 }
0x1267   :  { %v1188_v16 = vmul.f32 %v1610_v14, %v1186_v15 }
0x1269   :  { %1190 = vrot.lane.b32.xlu1 %v1188_v16, %s1719_s3 }
0x12db   :  { %v1191_v18 = vpop.permute.xlu1 %1190 }
0x12dc   :  { %v1193_v19 = vadd.f32 %v1191_v18, %v1183_v17 }
0x12de   :  { %1611 = vtanh.f32 %v1193_v19 }
0x12e8   :  { %v1612_v20 = vpop.eup %1611 }
0x12e9   :  { %1196 = vrot.lane.b32.xlu0 %v1612_v20, %s1726_s1 }
0x135b   :  { %v1197_v21 = vpop.permute.xlu0 %1196 }
0x135c   :  { %v1199_v22 = vmul.f32 %v1610_v14, %v1197_v21 }
0x135e   :  { %1201 = vrot.lane.b32.xlu1 %v1199_v22, %s1719_s3 }
0x13d0   :  { %v1202_v23 = vpop.permute.xlu1 %1201 }
0x13d1   :  { %1205 = vst.msk [vmem:[#allocation9 + $0xc] sm:$0x3] %vm574_vm2, %v1202_v23  ;;  %1488 = vmatmul.mubr.msk.f32.vlgmr.msra.gmra.mrb[8].mxu0 %vm471_vm3, %v1202_v23 }
0x14a4   :  { %v1276_v25 = vpop.f32.mrb[8].mxu0 }
0x14a5   :  { %v1280_v26 = vadd.f32 %v1276_v25, %v1207_v24  ;;  %v1489_v27 = vpop.f32.mrb[9].mxu0 }
0x14a7   :  { %1613 = vtanh.f32 %v1280_v26  ;;  %v1350_v30 = vmul.f32 -1.442695, %v1280_v26 }
0x14a9   :  { %1615 = vpow2.f32 %v1350_v30 }
0x14b1   :  { %v1614_v28 = vpop.eup %1613 }
0x14b2   :  { %1290 = vrot.lane.b32.xlu0 %v1614_v28, %s1726_s1 }
0x14b3   :  { %v1616_v10 = vpop.eup %1615 }
0x14b4   :  { %v1284_v31 = vadd.f32 1.0, %v1616_v10 }
0x14b6   :  { %1617 = vrcp.f32 %v1284_v31 }
0x14c0   :  { %v1618_v32 = vpop.eup %1617 }
0x14c1   :  { %v1288_v36 = vmul.f32 %v1618_v32, %v1193_v19 }
0x1524   :  { %v1291_v34 = vpop.permute.xlu0 %1290 }
0x1525   :  { %v1293_v35 = vmul.f32 %v1618_v32, %v1291_v34 }
0x1527   :  { %1295 = vrot.lane.b32.xlu1 %v1293_v35, %s1719_s3 }
0x1599   :  { %v1296_v37 = vpop.permute.xlu1 %1295 }
0x159a   :  { %v1298_v38 = vadd.f32 %v1296_v37, %v1288_v36 }
0x159c   :  { %1619 = vtanh.f32 %v1298_v38 }
0x15a6   :  { %v1620_v39 = vpop.eup %1619 }
0x15a7   :  { %1301 = vrot.lane.b32.xlu0 %v1620_v39, %s1726_s1 }
0x1619   :  { %v1302_v40 = vpop.permute.xlu0 %1301 }
0x161a   :  { %v1304_v41 = vmul.f32 %v1618_v32, %v1302_v40 }
0x161c   :  { %1306 = vrot.lane.b32.xlu1 %v1304_v41, %s1719_s3 }
0x168e   :  { %v1307_v42 = vpop.permute.xlu1 %1306 }
0x168f   :  { %1310 = vst.msk [vmem:[#allocation9 + $0xe] sm:$0x3] %vm574_vm2, %v1307_v42 }
0x1690   :  { %1698 = shalt.err (!%p1695_p0)
}
0x1691   :  { %s1699_s13 = scalar_lea.hbm %s1963_s5, 256 }
0x1692   :  { %p1700_p1 = scmp.ne.s32.totalorder %s1963_s5, %s1699_s13  ;;  %p1703_p2 = scmp.lt.u32.totalorder %s1699_s13, %s1963_s5 }
0x1694   :  { %p1705_p3 = pnand %p1703_p2, %p1700_p1 }
0x1696   :  { %1708 = shalt.err (!%p1705_p3)
}
0x1697   :  { %1322 = dma.vmem_to_hbm [thread:$0]  %s1317_s9, 256, %s1963_s5, [#allocation5], %s1719_s3, %s1719_s3, %s1720_s17  }
0x1698   :  { %1713 = dma.done.wait [#allocation5], 256  }
0x1699   :  { %1714 = vsyncadd [#allocation5], 4294967040 }
0x169a   :  { %1326 = vsyncpa [#allocation4], 1 }
0x169b   :  { %1327 = vsyncpa [#allocation7], 1 }
0x169c   :  { %1328 = vsyncpa [#allocation5], 1 }

</bundles_post_ra>
